<compile_context>
chip_gen: v7x
topology: tpu7x:2x2x1
jax: 0.10.0
libtpu: 0.0.40
codegen_flags: <defaults>
</compile_context>

<pallas_src>
import jax
import jax.numpy as jnp
import numpy as np
from jax.experimental import pallas as pl
from jax.experimental.pallas import tpu as pltpu


# --------------------------------------------------------------------------- #
# Kernels
# --------------------------------------------------------------------------- #
def _pool_kernel(x_ref, eh_ref, ew_ref, ph_ref, pw_ref):
    """Coordinate pooling via MXU matmuls.

    x_ref : (1, TC, H*W)    lane-dense channel tile
    eh_ref: (H*W, H)        column j has 1/W where row//W == j  (mean over width)
    ew_ref: (H*W, W)        column j has 1/H where row%W  == j  (mean over height)
    ph_ref: (1, TC, H), pw_ref: (1, TC, W)
    """
    x = x_ref[0].astype(jnp.float32)                       # (TC, HW)
    ph_ref[0] = jnp.dot(x, eh_ref[...],
                        preferred_element_type=jnp.float32).astype(ph_ref.dtype)
    pw_ref[0] = jnp.dot(x, ew_ref[...],
                        preferred_element_type=jnp.float32).astype(pw_ref.dtype)


def _gates_kernel(ph_ref, pw_ref, w1_ref, b1_ref, s_ref, t_ref,
                  wh_ref, bh_ref, ww_ref, bw_ref, ah_ref, aw_ref):
    """1x1 convs + folded BatchNorm + h_swish + 1x1 convs + sigmoid.

    conv1 is applied separately to each pooled direction (no concat/split
    relayouts).  ph_ref: (1, C, H), pw_ref: (1, C, W); gates: (1, OUP, H/W).
    """
    def branch(pool, wo_ref, bo_ref):
        y = jnp.dot(w1_ref[...], pool,
                    preferred_element_type=jnp.float32) + b1_ref[...]   # (MIP, L)
        y = y * s_ref[...] + t_ref[...]                                  # folded BN
        y = y * (jnp.clip(y + 3.0, 0.0, 6.0) * (1.0 / 6.0))              # h_swish
        a = jnp.dot(wo_ref[...], y,
                    preferred_element_type=jnp.float32) + bo_ref[...]    # (OUP, L)
        return jax.nn.sigmoid(a)

    ah_ref[0] = branch(ph_ref[0], wh_ref, bh_ref).astype(ah_ref.dtype)
    aw_ref[0] = branch(pw_ref[0], ww_ref, bw_ref).astype(aw_ref.dtype)


def _modulate_kernel(x_ref, ah_ref, aw_ref, gh_ref, gw_ref, o_ref):
    """out = x * a_h * a_w, lane-dense streaming.

    x_ref : (1, TC, H*W)
    ah_ref: (1, TC, H), aw_ref: (1, TC, W)
    gh_ref: (H, H*W) 0/1 matrix with gh[j, i] = (i // W == j)
    gw_ref: (W, H*W) 0/1 matrix with gw[j, i] = (i %  W == j)
    The gate broadcast over the flattened spatial axis is an exact MXU matmul
    (each output element picks exactly one gate value), so no relayouts.
    """
    x = x_ref[0].astype(jnp.float32)                       # (TC, HW)
    gate_h = jnp.dot(ah_ref[0], gh_ref[...],
                     preferred_element_type=jnp.float32)   # (TC, HW)
    gate_w = jnp.dot(aw_ref[0], gw_ref[...],
                     preferred_element_type=jnp.float32)   # (TC, HW)
    o_ref[0] = (x * gate_h * gate_w).astype(o_ref.dtype)


# --------------------------------------------------------------------------- #
# Wrapper
# --------------------------------------------------------------------------- #
def _pick_channel_tile(c, hw, itemsize=4, target_bytes=1 << 20):
    """Largest channel tile that (a) divides C, (b) is a multiple of 8 or == C,
    (c) keeps a block around ~1 MiB so double-buffered in+out fits easily in
    v7x's 32 MiB scoped VMEM."""
    if c % 8 != 0:
        return c                       # must use the full (small) channel dim
    tc = c
    while tc % 16 == 0 and tc * hw * itemsize > target_bytes:
        tc //= 2
    return tc


def ca_forward(x, params, eps=1e-5):
    n, c, h, w = x.shape
    mip = params["w1"].shape[0]
    oup = params["wh"].shape[0]
    assert oup == c, "CA modulation requires oup == inp (gates multiply identity x)"

    f32 = jnp.float32
    hw = h * w
    xf = x.reshape(n, c, hw)                               # free (contiguous NCHW)

    # Constant pooling / broadcast-selection matrices (tiny; held resident in VMEM
    # across grid steps via constant-index BlockSpecs, same as the weights).
    row_of = jnp.arange(hw, dtype=jnp.int32) // w
    col_of = jnp.arange(hw, dtype=jnp.int32) % w
    gh = (row_of[None, :] == jnp.arange(h, dtype=jnp.int32)[:, None]).astype(f32)  # (H, HW)
    gw = (col_of[None, :] == jnp.arange(w, dtype=jnp.int32)[:, None]).astype(f32)  # (W, HW)
    eh = gh.T * (1.0 / w)                                  # (HW, H): mean over width
    ew = gw.T * (1.0 / h)                                  # (HW, W): mean over height

    tc = _pick_channel_tile(c, hw, x.dtype.itemsize)

    # --------- stage 1: coordinate pools (lane-dense, MXU reductions) --------- #
    full2 = lambda shp: pl.BlockSpec(shp, lambda i, j: (0, 0))
    ph, pw = pl.pallas_call(
        _pool_kernel,
        out_shape=(jax.ShapeDtypeStruct((n, c, h), f32),
                   jax.ShapeDtypeStruct((n, c, w), f32)),
        grid=(n, c // tc),
        in_specs=[pl.BlockSpec((1, tc, hw), lambda i, j: (i, j, 0)),
                  full2((hw, h)),
                  full2((hw, w))],
        out_specs=(pl.BlockSpec((1, tc, h), lambda i, j: (i, j, 0)),
                   pl.BlockSpec((1, tc, w), lambda i, j: (i, j, 0))),
        compiler_params=pltpu.CompilerParams(
            dimension_semantics=("parallel", "parallel")),
    )(xf, eh, ew)

    # --------- stage 2: gates (1x1 convs + BN + h_swish + sigmoid) ------------ #
    # TODO(synk): BatchNorm is folded in eval mode (running stats); training-mode
    # batch statistics are data-dependent and not modelled here.
    bn_scale = params["gamma"] / jnp.sqrt(params["rvar"] + eps)
    bn_shift = params["beta"] - params["rmean"] * bn_scale
    col = lambda v: v.reshape(-1, 1).astype(f32)
    fullw = lambda shp: pl.BlockSpec(shp, lambda i: (0,) * len(shp))

    ah, aw = pl.pallas_call(
        _gates_kernel,
        out_shape=(jax.ShapeDtypeStruct((n, oup, h), f32),
                   jax.ShapeDtypeStruct((n, oup, w), f32)),
        grid=(n,),
        in_specs=[pl.BlockSpec((1, c, h), lambda i: (i, 0, 0)),
                  pl.BlockSpec((1, c, w), lambda i: (i, 0, 0)),
                  fullw((mip, c)), fullw((mip, 1)), fullw((mip, 1)), fullw((mip, 1)),
                  fullw((oup, mip)), fullw((oup, 1)),
                  fullw((oup, mip)), fullw((oup, 1))],
        out_specs=(pl.BlockSpec((1, oup, h), lambda i: (i, 0, 0)),
                   pl.BlockSpec((1, oup, w), lambda i: (i, 0, 0))),
        compiler_params=pltpu.CompilerParams(dimension_semantics=("parallel",)),
    )(ph, pw,
      params["w1"].astype(f32), col(params["b1"]), col(bn_scale), col(bn_shift),
      params["wh"].astype(f32), col(params["bh"]),
      params["ww"].astype(f32), col(params["bw"]))

    # --------- stage 3: tiled, HBM-bound elementwise modulation --------------- #
    out_flat = pl.pallas_call(
        _modulate_kernel,
        out_shape=jax.ShapeDtypeStruct((n, c, hw), x.dtype),
        grid=(n, c // tc),
        in_specs=[pl.BlockSpec((1, tc, hw), lambda i, j: (i, j, 0)),
                  pl.BlockSpec((1, tc, h), lambda i, j: (i, j, 0)),
                  pl.BlockSpec((1, tc, w), lambda i, j: (i, j, 0)),
                  full2((h, hw)),
                  full2((w, hw))],
        out_specs=pl.BlockSpec((1, tc, hw), lambda i, j: (i, j, 0)),
        compiler_params=pltpu.CompilerParams(
            dimension_semantics=("parallel", "parallel")),
    )(xf, ah, aw, gh, gw)

    return out_flat.reshape(n, c, h, w)


# --------------------------------------------------------------------------- #
# Pure-JAX reference (matches the PyTorch forward, BN in eval mode)
# --------------------------------------------------------------------------- #
def ca_reference(x, p, eps=1e-5):
    n, c, h, w = x.shape
    pool_h = jnp.mean(x, axis=3, keepdims=True)                 # (n,c,h,1)
    pool_w = jnp.mean(x, axis=2, keepdims=True)                 # (n,c,1,w)
    xw = jnp.transpose(pool_w, (0, 1, 3, 2))                    # (n,c,w,1)
    y = jnp.concatenate([pool_h, xw], axis=2)                   # (n,c,h+w,1)
    y = jnp.einsum("mc,nckl->nmkl", p["w1"], y) + p["b1"][None, :, None, None]
    scale = p["gamma"] / jnp.sqrt(p["rvar"] + eps)
    shift = p["beta"] - p["rmean"] * scale
    y = y * scale[None, :, None, None] + shift[None, :, None, None]
    y = y * (jnp.clip(y + 3.0, 0.0, 6.0) / 6.0)
    yh, yw = y[:, :, :h, :], y[:, :, h:, :]
    yw = jnp.transpose(yw, (0, 1, 3, 2))
    a_h = jax.nn.sigmoid(jnp.einsum("om,nmkl->nokl", p["wh"], yh) + p["bh"][None, :, None, None])
    a_w = jax.nn.sigmoid(jnp.einsum("om,nmkl->nokl", p["ww"], yw) + p["bw"][None, :, None, None])
    return x * a_w * a_h


def init_params(key, inp, oup, reduction=32, dtype=jnp.float32):
    mip = max(8, inp // reduction)
    ks = jax.random.split(key, 6)
    return {
        "w1": 0.1 * jax.random.normal(ks[0], (mip, inp), dtype),
        "b1": 0.1 * jax.random.normal(ks[1], (mip,), dtype),
        "gamma": jnp.ones((mip,), dtype),
        "beta": jnp.zeros((mip,), dtype),
        "rmean": jnp.zeros((mip,), dtype),
        "rvar": jnp.ones((mip,), dtype),
        "wh": 0.1 * jax.random.normal(ks[2], (oup, mip), dtype),
        "bh": 0.1 * jax.random.normal(ks[3], (oup,), dtype),
        "ww": 0.1 * jax.random.normal(ks[4], (oup, mip), dtype),
        "bw": 0.1 * jax.random.normal(ks[5], (oup,), dtype),
    }


if __name__ == "__main__":
    key = jax.random.PRNGKey(0)
    k_x, k_p = jax.random.split(key)

    n, c, h, w = 2, 4, 16, 16         # inp == oup == 4, mip = max(8, 4//32) = 8
    x = jax.random.normal(k_x, (n, c, h, w), jnp.float32)
    params = init_params(k_p, inp=c, oup=c)

    out = jax.block_until_ready(ca_forward(x, params))
    ref = ca_reference(x, params)
    np.testing.assert_allclose(np.asarray(out), np.asarray(ref), rtol=1e-5, atol=1e-5)

    print("KERNEL_OK")
</pallas_src>

<mosaic_0001>
module attributes {stable_mosaic.version = 11 : i64} {
  func.func @_pool_kernel(%arg0: i32, %arg1: i32, %arg2: memref<1x4x256xf32, #tpu.memory_space<vmem>>, %arg3: memref<256x16xf32, #tpu.memory_space<vmem>>, %arg4: memref<256x16xf32, #tpu.memory_space<vmem>>, %arg5: memref<1x4x16xf32, #tpu.memory_space<vmem>>, %arg6: memref<1x4x16xf32, #tpu.memory_space<vmem>>) attributes {dimension_semantics = [#tpu.dimension_semantics<parallel>, #tpu.dimension_semantics<parallel>], iteration_bounds = array<i64: 2, 1>, scalar_prefetch = 0 : i64, scratch_operands = 0 : i64, tpu.core_type = #tpu.core_type<tc>, window_params = [{transform_indices = @transform_0, window_bounds = array<i64: 1, 4, 256>}, {pipeline_mode = #tpu.pipeline_mode<synchronous>, transform_indices = @transform_1, window_bounds = array<i64: 256, 16>}, {pipeline_mode = #tpu.pipeline_mode<synchronous>, transform_indices = @transform_2, window_bounds = array<i64: 256, 16>}, {transform_indices = @transform_3, window_bounds = array<i64: 1, 4, 16>}, {transform_indices = @transform_4, window_bounds = array<i64: 1, 4, 16>}]} {
    %c0 = arith.constant 0 : index
    %c0_0 = arith.constant 0 : index
    %c0_1 = arith.constant 0 : index
    %0 = vector.load %arg2[%c0, %c0_0, %c0_1] : memref<1x4x256xf32, #tpu.memory_space<vmem>>, vector<1x4x256xf32>
    %1 = vector.shape_cast %0 : vector<1x4x256xf32> to vector<4x256xf32>
    %c0_2 = arith.constant 0 : index
    %c0_3 = arith.constant 0 : index
    %2 = vector.load %arg3[%c0_2, %c0_3] : memref<256x16xf32, #tpu.memory_space<vmem>>, vector<256x16xf32>
    %cst = arith.constant dense<0.000000e+00> : vector<4x16xf32>
    %3 = tpu.matmul %1, %2, %cst {dimension_numbers = #tpu.dot_dimension_numbers<[1], [0], [0], [1], [0, 0, 1, 1], [], []>} : vector<4x256xf32>, vector<256x16xf32>, vector<4x16xf32> -> vector<4x16xf32>
    %c0_4 = arith.constant 0 : index
    %c0_5 = arith.constant 0 : index
    %c0_6 = arith.constant 0 : index
    %4 = vector.load %arg5[%c0_4, %c0_5, %c0_6] : memref<1x4x16xf32, #tpu.memory_space<vmem>>, vector<1x4x16xf32>
    %5 = vector.shape_cast %4 : vector<1x4x16xf32> to vector<4x16xf32>
    %6 = vector.shape_cast %3 : vector<4x16xf32> to vector<1x4x16xf32>
    tpu.vector_store %arg5[%c0_4, %c0_5, %c0_6], %6 {strides = array<i32>} : memref<1x4x16xf32, #tpu.memory_space<vmem>>, vector<1x4x16xf32>,
    %c0_7 = arith.constant 0 : index
    %c0_8 = arith.constant 0 : index
    %7 = vector.load %arg4[%c0_7, %c0_8] : memref<256x16xf32, #tpu.memory_space<vmem>>, vector<256x16xf32>
    %cst_9 = arith.constant dense<0.000000e+00> : vector<4x16xf32>
    %8 = tpu.matmul %1, %7, %cst_9 {dimension_numbers = #tpu.dot_dimension_numbers<[1], [0], [0], [1], [0, 0, 1, 1], [], []>} : vector<4x256xf32>, vector<256x16xf32>, vector<4x16xf32> -> vector<4x16xf32>
    %c0_10 = arith.constant 0 : index
    %c0_11 = arith.constant 0 : index
    %c0_12 = arith.constant 0 : index
    %9 = vector.load %arg6[%c0_10, %c0_11, %c0_12] : memref<1x4x16xf32, #tpu.memory_space<vmem>>, vector<1x4x16xf32>
    %10 = vector.shape_cast %9 : vector<1x4x16xf32> to vector<4x16xf32>
    %11 = vector.shape_cast %8 : vector<4x16xf32> to vector<1x4x16xf32>
    tpu.vector_store %arg6[%c0_10, %c0_11, %c0_12], %11 {strides = array<i32>} : memref<1x4x16xf32, #tpu.memory_space<vmem>>, vector<1x4x16xf32>,
    return
  }
  func.func @transform_0(%arg0: i32, %arg1: i32) -> (i32, i32, i32) {
    %c0_i32 = arith.constant 0 : i32
    %c0_i32_0 = arith.constant 0 : i32
    return %arg0, %arg1, %c0_i32 : i32, i32, i32
  }
  func.func @transform_1(%arg0: i32, %arg1: i32) -> (i32, i32) {
    %c0_i32 = arith.constant 0 : i32
    %c0_i32_0 = arith.constant 0 : i32
    %c0_i32_1 = arith.constant 0 : i32
    return %c0_i32, %c0_i32_0 : i32, i32
  }
  func.func @transform_2(%arg0: i32, %arg1: i32) -> (i32, i32) {
    %c0_i32 = arith.constant 0 : i32
    %c0_i32_0 = arith.constant 0 : i32
    %c0_i32_1 = arith.constant 0 : i32
    return %c0_i32, %c0_i32_0 : i32, i32
  }
  func.func @transform_3(%arg0: i32, %arg1: i32) -> (i32, i32, i32) {
    %c0_i32 = arith.constant 0 : i32
    %c0_i32_0 = arith.constant 0 : i32
    return %arg0, %arg1, %c0_i32 : i32, i32, i32
  }
  func.func @transform_4(%arg0: i32, %arg1: i32) -> (i32, i32, i32) {
    %c0_i32 = arith.constant 0 : i32
    %c0_i32_0 = arith.constant 0 : i32
    return %arg0, %arg1, %c0_i32 : i32, i32, i32
  }
}

</mosaic_0001>

<bundles_post_ra>
// kernel: tpu_custom_call.1
= control target key start
LH: loop header
LB: loop body
LE: loop exit
PB: predicated region body
PF: predicated region fallthrough
CT: control target
= control target key end

     0   :  { %10 = vsyncpa [#allocation3], 0  ;;  %s1290_s0 = inlined_call_operand.vmem [shape: f32[2,4,256], index: 0, kind: input, shape index: {}]   ;;  %s1291_s1 = inlined_call_operand.vmem [shape: f32[256,16], index: 1, kind: input, shape index: {}]   ;;  %s1292_s2 = inlined_call_operand.vmem [shape: f32[256,16], index: 2, kind: input, shape index: {}]   ;;  %s1293_s3 = inlined_call_operand.hbm [shape: f32[2,4,16], index: 3, kind: output, shape index: {0}]   ;;  %s1294_s4 = inlined_call_operand.hbm [shape: f32[2,4,16], index: 4, kind: output, shape index: {1}]  }
   0x1   :  { %12 = vsyncpa [#allocation3 + $0x1], 0 }
   0x2   :  { %13 = vsyncpa [#allocation5], 0 }
   0x3   :  { %15 = vsyncpa [#allocation5 + $0x1], 0  ;;  %s942_s15 = smov 0   ;;  %s944_s16 = smov 0  }
   0x4   :  { %s946_s17 = smov 0   ;;  %s948_s18 = smov 0  }
   0x5   :  { %s950_s19 = smov 0   ;;  %s952_s20 = smov 0  }
   0x6 LB: > { %s592_s21 = sadd.s32 4294967295, %s913_s20   ;;  %s593_s22 = sadd.s32 4294967294, %s913_s20   ;;  %s913_s20 = sphi %s952_s20, %s21_s20   ;;  %s909_s19 = sphi %s950_s19, %s1301_s19   ;;  %s905_s18 = sphi %s948_s18, %s1300_s18   ;;  %s901_s17 = sphi %s946_s17, %s1299_s17   ;;  %s897_s16 = sphi %s944_s16, %s1298_s16   ;;  %s893_s15 = sphi %s942_s15, %s1297_s15  }
   0x7   : > { %s33_s23 = sadd.s32 1, %s909_s19  ;;  %s112_s24 = sadd.s32 1, %s901_s17 }
   0x8   : > { %p35_p0 = scmp.ge.s32.totalorder %s33_s23, 2  ;;  %p122_p1 = scmp.ne.s32.totalorder %s901_s17, %s897_s16 }
   0x9   : > { %p123_p2 = scmp.eq.s32.totalorder %s592_s21, 1  ;;  %p128_p3 = scmp.ne.s32.totalorder %s897_s16, %s893_s15 }
   0xa   : > { %s1303_s23 = smov (%p35_p0, %s33_s23), 0  ;;  %p129_p5 = scmp.eq.s32.totalorder %s593_s22, 1 }
   0xb   : > { %p982_p4 = por %p123_p2, %p122_p1  ;;  %s107_s26 = ssub.s32 %s909_s19, %s1303_s23 }
   0xc   : > { %p596_p6 = scmp.ge.s32.totalorder %s913_s20, 1  ;;  %p110_p7 = scmp.eq.s32.totalorder %s107_s26, 0 }
   0xd   : > { %p989_p8 = por %p129_p5, %p128_p3  ;;  %p193_p9 = scmp.lt.s32.totalorder %s913_s20, 3 }
   0xe   : > { %s995_s28 = scalar_select %p110_p7, %s901_s17, %s112_s24  }
   0xf   : > { %p194_p10 = pnand %p596_p6, %p193_p9 }
  0x10   : > { %v254_v0 = vld [vmem:[%s1291_s1 + $0x80] sm:$0xff] (!%p194_p10)  ;;  %v255_v1 = vld [vmem:[%s1291_s1 + $0x88] sm:$0xff] (!%p194_p10)  ;;  %v256_v11 = vld [vmem:[%s1291_s1 + $0x90] sm:$0xff] (!%p194_p10)  ;;  %p228_p11 = scmp.lt.s32.totalorder (!%p194_p10), %s905_s18, 1  ;;  %s1200_s8 = sand.u32 (!%p194_p10), 1, %s897_s16   ;;  %vm343_vm0 = vcmask (!%p194_p10), 125952  }
  0x11   : > { %197 = sbr.rel (%p194_p10) target bundleno = 304 (0x130), region = 32  ;;  %v361_v2 = vld [vmem:[%s1292_s2 + $0x80] sm:$0xff] (!%p194_p10)  ;;  %v678_v3 = vpack.c.bf16 (!%p194_p10), %v255_v1, %v254_v0  ;;  %v362_v4 = vld [vmem:[%s1292_s2 + $0x88] sm:$0xff] (!%p194_p10)  ;;  %v257_v13 = vld [vmem:[%s1291_s1 + $0x98] sm:$0xff] (!%p194_p10)  ;;  %s597_s9 = sshll.u32 (!%p194_p10), %s1200_s8, 2 }
  0x12   : > { %v238_v5 = vld [vmem:[%s1291_s1] sm:$0xff] (!%p194_p10)  ;;  %v239_v6 = vld [vmem:[%s1291_s1 + $0x8] sm:$0xff] (!%p194_p10)  ;;  %v710_v7 = vpack.c.bf16 (!%p194_p10), %v362_v4, %v361_v2  ;;  %v363_v14 = vld [vmem:[%s1292_s2 + $0x90] sm:$0xff] (!%p194_p10)  ;;  %v682_v16 = vpack.c.bf16 (!%p194_p10), %v257_v13, %v256_v11  ;;  %s603_s10 = sshll.u32 (!%p194_p10), %s905_s18, 6  ;;  %s220_s14 = scalar_lea.vmem (!%p194_p10), [#allocation2], %s597_s9 }
  0x13   : > { %v680_v8 = vpack.c.bf16 (!%p194_p10), %v239_v6, %v238_v5  ;;  %v345_v9 = vld [vmem:[%s1292_s2] sm:$0xff] (!%p194_p10)  ;;  %v346_v10 = vld [vmem:[%s1292_s2 + $0x8] sm:$0xff] (!%p194_p10)  ;;  %679 = vmatprep.subr.bf16.mxu0 (!%p194_p10), %v678_v3  ;;  %v364_v15 = vld [vmem:[%s1292_s2 + $0x98] sm:$0xff] (!%p194_p10)  ;;  %s468_s21 = sshll.u32 (!%p194_p10), %s220_s14, 4  ;;  %s1204_s22 = scalar_lea.vmem (!%p194_p10), [#allocation4], %s597_s9  ;;  %s1212_s21 = int_to_ptr.vmem [resolvable:$true] %s468_s21 }
  0x14   : > { %v712_v12 = vpack.c.bf16 (!%p194_p10), %v346_v10, %v345_v9  ;;  %711 = vmatprep.subr.bf16.mxu1 (!%p194_p10), %v710_v7  ;;  %v714_v17 = vpack.c.bf16 (!%p194_p10), %v364_v15, %v363_v14  ;;  %v240_v18 = vld [vmem:[%s1291_s1 + $0x10] sm:$0xff] (!%p194_p10)  ;;  %v241_v19 = vld [vmem:[%s1291_s1 + $0x18] sm:$0xff] (!%p194_p10)  ;;  %v258_v23 = vld [vmem:[%s1291_s1 + $0xa0] sm:$0xff] (!%p194_p10)  ;;  %s1210_s29 = scalar_lea.hbm (!%p194_p10), %s1293_s3, %s603_s10  ;;  %s449_s30 = scalar_lea.sflag (!%p194_p10), [#allocation3], %s1200_s8 }
  0x15   : > { %681 = vmatpush3.bf16.msra.mxu0 (!%p194_p10), %v680_v8  ;;  %v347_v20 = vld [vmem:[%s1292_s2 + $0x10] sm:$0xff] (!%p194_p10)  ;;  %v684_v21 = vpack.c.bf16 (!%p194_p10), %v241_v19, %v240_v18  ;;  %v348_v22 = vld [vmem:[%s1292_s2 + $0x18] sm:$0xff] (!%p194_p10)  ;;  %v259_v24 = vld [vmem:[%s1291_s1 + $0xa8] sm:$0xff] (!%p194_p10)  ;;  %s803_s5 = scalar_lea.vmem (!%p194_p10), %s1212_s21, 64  ;;  %s915_s6 = smov (!%p194_p10), [#allocation2]  }
  0x16   : > { %713 = vmatpush3.bf16.msra.mxu1 (!%p194_p10), %v712_v12  ;;  %683 = vmatprep.subr.bf16.mxu0 (!%p194_p10), %v682_v16  ;;  %v716_v25 = vpack.c.bf16 (!%p194_p10), %v348_v22, %v347_v20  ;;  %v686_v26 = vpack.c.bf16 (!%p194_p10), %v259_v24, %v258_v23  ;;  %v365_v27 = vld [vmem:[%s1292_s2 + $0xa0] sm:$0xff] (!%p194_p10)  ;;  %v366_v28 = vld [vmem:[%s1292_s2 + $0xa8] sm:$0xff] (!%p194_p10)  ;;  %v260_v35 = vld [vmem:[%s1291_s1 + $0xb0] sm:$0xff] (!%p194_p10)  ;;  %p804_p12 = scmp.ne.s32.totalorder (!%p194_p10), %s1212_s21, %s803_s5  ;;  %s807_s7 = sshll.u32 (!%p194_p10), %s915_s6, 4  ;;  %s808_s7 = int_to_ptr.vmem [resolvable:$false] %s807_s7 }
  0x17   : > { %715 = vmatprep.subr.bf16.mxu1 (!%p194_p10), %v714_v17  ;;  %v242_v29 = vld [vmem:[%s1291_s1 + $0x20] sm:$0xff] (!%p194_p10)  ;;  %v718_v30 = vpack.c.bf16 (!%p194_p10), %v366_v28, %v365_v27  ;;  %v243_v31 = vld [vmem:[%s1291_s1 + $0x28] sm:$0xff] (!%p194_p10)  ;;  %v261_v36 = vld [vmem:[%s1291_s1 + $0xb8] sm:$0xff] (!%p194_p10)  ;;  %s809_s9 = scalar_lea.vmem (!%p194_p10), %s808_s7, 128  ;;  %p810_p1 = scmp.lt.s32.totalorder (!%p194_p10), %s1212_s21, %s808_s7 }
  0x18   : > { %v349_v32 = vld [vmem:[%s1292_s2 + $0x20] sm:$0xff]  ;;  %v350_v33 = vld [vmem:[%s1292_s2 + $0x28] sm:$0xff]  ;;  %v688_v34 = vpack.c.bf16 %v243_v31, %v242_v29  ;;  %v367_v37 = vld [vmem:[%s1292_s2 + $0xb0] sm:$0xff]  ;;  %v690_v39 = vpack.c.bf16 %v261_v36, %v260_v35  ;;  %s1109_s11 = scalar_select %p228_p11, %s905_s18, 1 }
  0x19   : > { %685 = vmatpush3.bf16.msra.mxu0 %v684_v21  ;;  %v720_v38 = vpack.c.bf16 %v350_v33, %v349_v32  ;;  %v368_v40 = vld [vmem:[%s1292_s2 + $0xb8] sm:$0xff]  ;;  %v244_v41 = vld [vmem:[%s1291_s1 + $0x30] sm:$0xff]  ;;  %v262_v46 = vld [vmem:[%s1291_s1 + $0xc0] sm:$0xff]  ;;  %p805_p13 = pnand %p804_p12, %p982_p4  ;;  %p811_p2 = scmp.lt.s32.totalorder %s809_s9, %s803_s5 }
  0x1a   : > { %717 = vmatpush3.bf16.msra.mxu1 %v716_v25  ;;  %687 = vmatprep.subr.bf16.mxu0 %v686_v26  ;;  %v245_v42 = vld [vmem:[%s1291_s1 + $0x38] sm:$0xff]  ;;  %v722_v43 = vpack.c.bf16 %v368_v40, %v367_v37  ;;  %v351_v44 = vld [vmem:[%s1292_s2 + $0x30] sm:$0xff]  ;;  %v263_v47 = vld [vmem:[%s1291_s1 + $0xc8] sm:$0xff]  ;;  %s607_s13 = sshll.u32 %s1109_s11, 3 }
  0x1b   : > { %719 = vmatprep.subr.bf16.mxu1 %v718_v30  ;;  %v352_v45 = vld [vmem:[%s1292_s2 + $0x38] sm:$0xff]  ;;  %v369_v48 = vld [vmem:[%s1292_s2 + $0xc0] sm:$0xff]  ;;  %v370_v49 = vld [vmem:[%s1292_s2 + $0xc8] sm:$0xff]  ;;  %v692_v50 = vpack.c.bf16 %v245_v42, %v244_v41  ;;  %v694_v52 = vpack.c.bf16 %v263_v47, %v262_v46  ;;  %s236_s12 = scalar_lea.vmem %s1290_s0, %s607_s13  ;;  %s1217_s13 = scalar_lea.hbm %s1294_s4, %s603_s10 }
  0x1c   : > { %v724_v51 = vpack.c.bf16 %v352_v45, %v351_v44  ;;  %v246_v53 = vld [vmem:[%s1291_s1 + $0x40] sm:$0xff]  ;;  %v247_v54 = vld [vmem:[%s1291_s1 + $0x48] sm:$0xff]  ;;  %v726_v56 = vpack.c.bf16 %v370_v49, %v369_v48  ;;  %v264_v58 = vld [vmem:[%s1291_s1 + $0xd0] sm:$0xff]  ;;  %p806_p0 = pneg %p805_p13  ;;  %p812_p3 = por %p811_p2, %p810_p1 }
  0x1d   : > { %689 = vmatpush3.bf16.msra.mxu0 %v688_v34  ;;  %v353_v55 = vld [vmem:[%s1292_s2 + $0x40] sm:$0xff]  ;;  %v354_v57 = vld [vmem:[%s1292_s2 + $0x48] sm:$0xff]  ;;  %v265_v59 = vld [vmem:[%s1291_s1 + $0xd8] sm:$0xff]  ;;  %v696_v62 = vpack.c.bf16 %v247_v54, %v246_v53 }
  0x1e   : > { %721 = vmatpush3.bf16.msra.mxu1 %v720_v38  ;;  %691 = vmatprep.subr.bf16.mxu0 %v690_v39  ;;  %v371_v60 = vld [vmem:[%s1292_s2 + $0xd0] sm:$0xff]  ;;  %v372_v61 = vld [vmem:[%s1292_s2 + $0xd8] sm:$0xff]  ;;  %v728_v63 = vpack.c.bf16 %v354_v57, %v353_v55  ;;  %v698_v0 = vpack.c.bf16 %v265_v59, %v264_v58  ;;  %v266_v6 = vld [vmem:[%s1291_s1 + $0xe0] sm:$0xff]  ;;  %p813_p5 = pnand %p812_p3, %p806_p0 }
  0x1f   : > { %723 = vmatprep.subr.bf16.mxu1 %v722_v43  ;;  %v248_v1 = vld [vmem:[%s1291_s1 + $0x50] sm:$0xff]  ;;  %v249_v2 = vld [vmem:[%s1291_s1 + $0x58] sm:$0xff]  ;;  %v730_v4 = vpack.c.bf16 %v372_v61, %v371_v60  ;;  %v267_v7 = vld [vmem:[%s1291_s1 + $0xe8] sm:$0xff] }
  0x20   : > { %v355_v3 = vld [vmem:[%s1292_s2 + $0x50] sm:$0xff]  ;;  %v356_v5 = vld [vmem:[%s1292_s2 + $0x58] sm:$0xff]  ;;  %v373_v8 = vld [vmem:[%s1292_s2 + $0xe0] sm:$0xff]  ;;  %v700_v10 = vpack.c.bf16 %v249_v2, %v248_v1  ;;  %v702_v13 = vpack.c.bf16 %v267_v7, %v266_v6 }
  0x21   : > { %693 = vmatpush3.bf16.msra.mxu0 %v692_v50  ;;  %v374_v9 = vld [vmem:[%s1292_s2 + $0xe8] sm:$0xff]  ;;  %v250_v11 = vld [vmem:[%s1291_s1 + $0x60] sm:$0xff]  ;;  %v732_v12 = vpack.c.bf16 %v356_v5, %v355_v3  ;;  %v268_v19 = vld [vmem:[%s1291_s1 + $0xf0] sm:$0xff] }
  0x22   : > { %725 = vmatpush3.bf16.msra.mxu1 %v724_v51  ;;  %695 = vmatprep.subr.bf16.mxu0 %v694_v52  ;;  %v251_v14 = vld [vmem:[%s1291_s1 + $0x68] sm:$0xff]  ;;  %v357_v15 = vld [vmem:[%s1292_s2 + $0x60] sm:$0xff]  ;;  %v734_v17 = vpack.c.bf16 %v374_v9, %v373_v8  ;;  %v269_v20 = vld [vmem:[%s1291_s1 + $0xf8] sm:$0xff] }
  0x23   : > { %727 = vmatprep.subr.bf16.mxu1 %v726_v56  ;;  %v237_v16 = vld [vmem:[%s236_s12] sm:$0xff]  ;;  %v358_v18 = vld [vmem:[%s1292_s2 + $0x68] sm:$0xff]  ;;  %v375_v22 = vld [vmem:[%s1292_s2 + $0xf0] sm:$0xff]  ;;  %v704_v24 = vpack.c.bf16 %v251_v14, %v250_v11  ;;  %v706_v26 = vpack.c.bf16 %v269_v20, %v268_v19  ;;  %s482_s12 = sshll.u32 %s1204_s22, 4  ;;  %s1219_s12 = int_to_ptr.vmem [resolvable:$true] %s482_s12 }
  0x24   : > { %v271_v21 = vcombine.high %v237_v16, %v237_v16  ;;  %v376_v23 = vld [vmem:[%s1292_s2 + $0xf8] sm:$0xff]  ;;  %v736_v25 = vpack.c.bf16 %v358_v18, %v357_v15  ;;  %v252_v27 = vld [vmem:[%s1291_s1 + $0x70] sm:$0xff] }
  0x25   : > { %697 = vmatpush3.bf16.msra.mxu0 %v696_v62  ;;  %v253_v28 = vld [vmem:[%s1291_s1 + $0x78] sm:$0xff]  ;;  %v738_v29 = vpack.c.bf16 %v376_v23, %v375_v22  ;;  %v359_v30 = vld [vmem:[%s1292_s2 + $0x70] sm:$0xff] }
  0x26   : > { %729 = vmatpush3.bf16.msra.mxu1 %v728_v63  ;;  %699 = vmatprep.subr.bf16.mxu0 %v698_v0  ;;  %v360_v31 = vld [vmem:[%s1292_s2 + $0x78] sm:$0xff]  ;;  %v708_v32 = vpack.c.bf16 %v253_v28, %v252_v27 }
  0x27   : > { %731 = vmatprep.subr.bf16.mxu1 %v730_v4  ;;  %337 = vmatprep.mubr.f32.mxu0 %v271_v21  ;;  %v740_v33 = vpack.c.bf16 %v360_v31, %v359_v30 }
  0x28   : > { %441 = vmatprep.mubr.f32.mxu1 %v271_v21 }
  0x29   : > { %701 = vmatpush3.bf16.msra.mxu0 %v700_v10 }
  0x2a   : > { %733 = vmatpush3.bf16.msra.mxu1 %v732_v12  ;;  %703 = vmatprep.subr.bf16.mxu0 %v702_v13 }
  0x2b   : > { %735 = vmatprep.subr.bf16.mxu1 %v734_v17 }
  0x2d   : > { %705 = vmatpush3.bf16.msra.mxu0 %v704_v24 }
  0x2e   : > { %737 = vmatpush3.bf16.msra.mxu1 %v736_v25  ;;  %707 = vmatprep.subr.bf16.mxu0 %v706_v26 }
  0x2f   : > { %739 = vmatprep.subr.bf16.mxu1 %v738_v29 }
  0x31   : > { %709 = vmatpush3.bf16.msra.mxu0 %v708_v32 }
  0x32   : > { %741 = vmatpush3.bf16.msra.mxu1 %v740_v33 }
  0x34   : > { %338 = vmatmul.mubr.f32.vlgmr.msra.gmra.mrb[0].mxu0 %v237_v16 }
  0x35   : > { %442 = vmatmul.mubr.f32.vlgmr.msra.gmra.mrb[0].mxu1 %v237_v16 }
 0x107   : > { %v640_v34 = vpop.f32.mrb[0].mxu0 }
 0x108   : > { %v675_v35 = vpop.f32.mrb[0].mxu1  ;;  %v641_v36 = vpop.f32.mrb[1].mxu0 }
 0x109   : > { %v642_v37 = vadd.f32 %v641_v36, %v640_v34  ;;  %v676_v38 = vpop.f32.mrb[1].mxu1 }
 0x10a   : > { %v677_v39 = vadd.f32 %v676_v38, %v675_v35 }
 0x10b   : > { %344 = vst.msk [vmem:[%s220_s14] sm:$0xf] %vm343_vm0, %v642_v37 }
 0x10c   : > { %816 = shalt.err (!%p813_p5)
}
 0x10d   : > { %s817_s10 = scalar_lea.hbm %s1210_s29, 64  ;;  %s821_s26 = scalar_lea.hbm %s1293_s3, 128 }
 0x10e   : > { %p818_p6 = scmp.ne.s32.totalorder %s1210_s29, %s817_s10  ;;  %p822_p10 = scmp.lt.u32.totalorder %s1210_s29, %s1293_s3 }
 0x10f   : > { %p823_p11 = scmp.lt.u32.totalorder %s821_s26, %s817_s10  ;;  %p825_p13 = scmp.lt.u32.totalorder %s817_s10, %s1210_s29 }
 0x110   : > { %p819_p7 = pnand %p818_p6, %p982_p4 }
 0x111   : > { %p824_p12 = por %p823_p11, %p822_p10 }
 0x112   : > { %p820_p9 = pneg %p819_p7 }
 0x113   : > { %p826_p0 = por %p825_p13, %p824_p12 }
 0x115   : > { %p827_p1 = pnand %p826_p0, %p820_p9 }
 0x117   : > { %830 = shalt.err (!%p827_p1)
}
 0x118   : > { %742 = dma.vmem_to_hbm [thread:$0]  (%p982_p4), %s1212_s21, 64, %s1210_s29, %s449_s30   ;;  %447 = vst.msk [vmem:[%s1204_s22] sm:$0xf] %vm343_vm0, %v677_v39 }
 0x119   : > { %s454_s5 = scalar_lea.sflag [#allocation5], %s1200_s8  ;;  %s831_s6 = scalar_lea.vmem %s1219_s12, 64 }
 0x11a   : > { %p832_p2 = scmp.ne.s32.totalorder %s1219_s12, %s831_s6  ;;  %s916_s7 = smov [#allocation4]  }
 0x11b   : > { %s835_s9 = sshll.u32 %s916_s7, 4  ;;  %s836_s9 = int_to_ptr.vmem [resolvable:$false] %s835_s9 }
 0x11c   : > { %p833_p3 = pnand %p832_p2, %p982_p4  ;;  %s837_s10 = scalar_lea.vmem %s836_s9, 128 }
 0x11d   : > { %p838_p6 = scmp.lt.s32.totalorder %s1219_s12, %s836_s9  ;;  %p839_p7 = scmp.lt.s32.totalorder %s837_s10, %s831_s6 }
 0x11e   : > { %p834_p5 = pneg %p833_p3 }
 0x11f   : > { %p840_p9 = por %p839_p7, %p838_p6 }
 0x121   : > { %p841_p10 = pnand %p840_p9, %p834_p5 }
 0x123   : > { %844 = shalt.err (!%p841_p10)
}
 0x124   : > { %s845_s8 = scalar_lea.hbm %s1217_s13, 64  ;;  %s849_s29 = scalar_lea.hbm %s1294_s4, 128 }
 0x125   : > { %p846_p11 = scmp.ne.s32.totalorder %s1217_s13, %s845_s8  ;;  %p850_p0 = scmp.lt.u32.totalorder %s1217_s13, %s1294_s4 }
 0x126   : > { %p851_p1 = scmp.lt.u32.totalorder %s849_s29, %s845_s8  ;;  %p853_p3 = scmp.lt.u32.totalorder %s845_s8, %s1217_s13 }
 0x127   : > { %p847_p12 = pnand %p846_p11, %p982_p4 }
 0x128   : > { %p852_p2 = por %p851_p1, %p850_p0 }
 0x129   : > { %p848_p13 = pneg %p847_p12 }
 0x12a   : > { %p854_p5 = por %p853_p3, %p852_p2 }
 0x12c   : > { %p855_p6 = pnand %p854_p5, %p848_p13 }
 0x12e   : > { %858 = shalt.err (!%p855_p6)
}
 0x12f   : > { %743 = dma.vmem_to_hbm [thread:$0]  (%p982_p4), %s1219_s12, 64, %s1217_s13, %s454_s5  }
 0x130 PF: > { %p753_p7 = scmp.ge.s32.totalorder %s913_s20, 2  ;;  %s494_s24 = sand.u32 1, %s893_s15  }
 0x131   : > { %s495_s26 = scalar_lea.sflag [#allocation3], %s494_s24 }
 0x132   : > { %p747_p9 = pnand %p753_p7, %p989_p8 }
 0x134   : > { %884 = dma.done.wait (!%p747_p9), %s495_s26, 64  }
 0x135   : > { %886 = vsyncadd (!%p747_p9), %s495_s26, 4294967232  ;;  %s504_s18 = scalar_lea.sflag [#allocation5], %s494_s24 }
 0x136   : > { %888 = dma.done.wait (!%p747_p9), %s504_s18, 64  }
 0x137   : > { %890 = vsyncadd (!%p747_p9), %s504_s18, 4294967232  ;;  %s21_s20 = sadd.s32 1, %s913_s20   ;;  %s1297_s15 = smov %s897_s16 }
 0x138   : > { %p18_p10 = scmp.ge.s32.totalorder %s21_s20, 4   ;;  %s1298_s16 = smov %s901_s17 }
 0x139   : > { %s1299_s17 = smov %s995_s28  ;;  %s1300_s18 = smov %s909_s19 }
 0x13a   : > { %s1301_s19 = smov %s1303_s23  ;;  %20 = sbr.rel (!%p18_p10) target bundleno = 6 (0x6), region = 84 }
 0x141   :  { %509 = vsyncpa [#allocation3], 1 }
 0x142   :  { %511 = vsyncpa [#allocation3 + $0x1], 1 }
 0x143   :  { %512 = vsyncpa [#allocation5], 1 }
 0x144   :  { %514 = vsyncpa [#allocation5 + $0x1], 1 }

</bundles_post_ra>
